<compile_context>
chip_gen: v7x
topology: tpu7x:2x2x1
jax: 0.10.0
libtpu: 0.0.40
codegen_flags: <defaults>
</compile_context>

<pallas_src>
import jax
import jax.numpy as jnp
from jax.experimental import pallas as pl
from jax.experimental.pallas import tpu as pltpu


def _fc_softmax_kernel(x_ref, w_ref, b_ref, o_ref):
    # x_ref : (tm, ch)   VMEM tile of flattened input rows
    # w_ref : (ch, out)  full weight, resident (constant index map)
    # b_ref : (1, out)   bias, resident
    # o_ref : (tm, out)  output tile
    logits = (
        jnp.dot(x_ref[...], w_ref[...], preferred_element_type=jnp.float32)
        + b_ref[...]
    )
    m = jnp.max(logits, axis=-1, keepdims=True)
    e = jnp.exp(logits - m)
    # Row-sum on the MXU (nearly idle here) instead of a lane-sparse XLU reduce.
    ones = jnp.ones((e.shape[-1], 1), dtype=jnp.float32)
    denom = jnp.dot(e, ones, preferred_element_type=jnp.float32)
    # EUP approximate reciprocal: own VLIW slot, effectively free.
    o_ref[...] = (e * pl.reciprocal(denom, approx=True)).astype(o_ref.dtype)


def binary_classifier2_forward(x, weight, bias, *, tm=1024):
    """x: (t, b, n, ch); weight: (dis_output_dim, ch) [PyTorch layout]; bias: (dis_output_dim,)."""
    t, b, n, ch = x.shape
    out_dim = weight.shape[0]
    M = t * b * n

    x_flat = x.reshape(M, ch)
    w_t = weight.T                     # (ch, out)
    b2 = bias.reshape(1, out_dim)      # (1, out)

    # --- choose row tile ---------------------------------------------------
    # Big tile (kernel is HBM-bound), but:
    #   * multiple of 8 (sublane tiling),
    #   * at least 2 grid steps when M allows (v7x: 2 TCs share the parallel axis).
    M8 = ((M + 7) // 8) * 8
    tm_eff = min(tm, M8)
    if M8 // tm_eff < 2 and M8 >= 16:
        tm_eff = M8 // 2
    tm_eff = max(8, (tm_eff // 8) * 8)

    # Pad rows up to a multiple of the tile; padded rows are sliced off after.
    M_pad = ((M + tm_eff - 1) // tm_eff) * tm_eff
    if M_pad != M:
        x_flat = jnp.pad(x_flat, ((0, M_pad - M), (0, 0)))

    out = pl.pallas_call(
        _fc_softmax_kernel,
        out_shape=jax.ShapeDtypeStruct((M_pad, out_dim), x.dtype),
        grid_spec=pltpu.PrefetchScalarGridSpec(
            num_scalar_prefetch=0,
            grid=(M_pad // tm_eff,),
            in_specs=[
                pl.BlockSpec((tm_eff, ch), lambda i: (i, 0)),
                pl.BlockSpec((ch, out_dim), lambda i: (0, 0)),
                pl.BlockSpec((1, out_dim), lambda i: (0, 0)),
            ],
            out_specs=pl.BlockSpec((tm_eff, out_dim), lambda i: (i, 0)),
        ),
        compiler_params=pltpu.CompilerParams(
            dimension_semantics=("parallel",)
        ),
    )(x_flat, w_t, b2)

    return out[:M] if M_pad != M else out


if __name__ == "__main__":
    # Small shapes consistent with the module's forward: x is (t, b, n, ch).
    t, b, n, ch = 2, 2, 8, 32          # input_dim = ch = 32
    dis_output_dim = 16

    key = jax.random.PRNGKey(0)
    kx, kw, kb = jax.random.split(key, 3)

    x = jax.random.normal(kx, (t, b, n, ch), dtype=jnp.float32)
    # Deterministic synthetic parameters in PyTorch Linear layout (out, in).
    weight = jax.random.normal(kw, (dis_output_dim, ch), dtype=jnp.float32) * 0.1
    bias = jax.random.normal(kb, (dis_output_dim,), dtype=jnp.float32) * 0.1

    y = binary_classifier2_forward(x, weight, bias)
    y = jax.block_until_ready(y)

    # Sanity check against plain-JAX reference.  Tolerance is loosened slightly
    # because pl.reciprocal(approx=True) perturbs probabilities a tiny amount.
    ref = jax.nn.softmax(x.reshape(-1, ch) @ weight.T + bias, axis=-1)
    assert y.shape == (t * b * n, dis_output_dim)
    assert jnp.allclose(y, ref, atol=2e-3, rtol=2e-3)

    print("KERNEL_OK")
</pallas_src>

<mosaic_0001>
module attributes {stable_mosaic.version = 11 : i64} {
  func.func @_fc_softmax_kernel(%arg0: i32, %arg1: memref<16x32xf32, #tpu.memory_space<vmem>>, %arg2: memref<32x16xf32, #tpu.memory_space<vmem>>, %arg3: memref<1x16xf32, #tpu.memory_space<vmem>>, %arg4: memref<16x16xf32, #tpu.memory_space<vmem>>) attributes {dimension_semantics = [#tpu.dimension_semantics<parallel>], iteration_bounds = array<i64: 2>, scalar_prefetch = 0 : i64, scratch_operands = 0 : i64, tpu.core_type = #tpu.core_type<tc>, window_params = [{transform_indices = @transform_0, window_bounds = array<i64: 16, 32>}, {pipeline_mode = #tpu.pipeline_mode<synchronous>, transform_indices = @transform_1, window_bounds = array<i64: 32, 16>}, {pipeline_mode = #tpu.pipeline_mode<synchronous>, transform_indices = @transform_2, window_bounds = array<i64: 1, 16>}, {transform_indices = @transform_3, window_bounds = array<i64: 16, 16>}]} {
    %c0 = arith.constant 0 : index
    %c0_0 = arith.constant 0 : index
    %0 = vector.load %arg1[%c0, %c0_0] : memref<16x32xf32, #tpu.memory_space<vmem>>, vector<16x32xf32>
    %c0_1 = arith.constant 0 : index
    %c0_2 = arith.constant 0 : index
    %1 = vector.load %arg2[%c0_1, %c0_2] : memref<32x16xf32, #tpu.memory_space<vmem>>, vector<32x16xf32>
    %cst = arith.constant dense<0.000000e+00> : vector<16x16xf32>
    %2 = tpu.matmul %0, %1, %cst {dimension_numbers = #tpu.dot_dimension_numbers<[1], [0], [0], [1], [0, 0, 1, 1], [], []>} : vector<16x32xf32>, vector<32x16xf32>, vector<16x16xf32> -> vector<16x16xf32>
    %c0_3 = arith.constant 0 : index
    %c0_4 = arith.constant 0 : index
    %3 = vector.load %arg3[%c0_3, %c0_4] : memref<1x16xf32, #tpu.memory_space<vmem>>, vector<1x16xf32>
    %4 = vector.broadcast %3 : vector<1x16xf32> to vector<16x16xf32>
    %5 = arith.addf %2, %4 : vector<16x16xf32>
    %cst_5 = arith.constant dense<0xFF800000> : vector<16xf32>
    %6 = vector.multi_reduction <maximumf>, %5, %cst_5 [1] : vector<16x16xf32> to vector<16xf32>
    %7 = vector.shape_cast %6 : vector<16xf32> to vector<16x1xf32>
    %8 = vector.broadcast %7 : vector<16x1xf32> to vector<16x16xf32>
    %9 = arith.subf %5, %8 : vector<16x16xf32>
    %10 = math.exp %9 : vector<16x16xf32>
    %cst_6 = arith.constant 1.000000e+00 : f32
    %11 = vector.broadcast %cst_6 : f32 to vector<16x1xf32>
    %cst_7 = arith.constant dense<0.000000e+00> : vector<16x1xf32>
    %12 = tpu.matmul %10, %11, %cst_7 {dimension_numbers = #tpu.dot_dimension_numbers<[1], [0], [0], [1], [0, 0, 1, 1], [], []>} : vector<16x16xf32>, vector<16x1xf32>, vector<16x1xf32> -> vector<16x1xf32>
    %13 = tpu.reciprocal %12 {approx = true} : vector<16x1xf32> -> vector<16x1xf32>
    %14 = vector.broadcast %13 : vector<16x1xf32> to vector<16x16xf32>
    %15 = arith.mulf %10, %14 : vector<16x16xf32>
    %c0_8 = arith.constant 0 : index
    %c0_9 = arith.constant 0 : index
    %16 = vector.load %arg4[%c0_8, %c0_9] : memref<16x16xf32, #tpu.memory_space<vmem>>, vector<16x16xf32>
    tpu.vector_store %arg4[%c0_8, %c0_9], %15 {strides = array<i32>} : memref<16x16xf32, #tpu.memory_space<vmem>>, vector<16x16xf32>,
    return
  }
  func.func @transform_0(%arg0: i32) -> (i32, i32) {
    %c0_i32 = arith.constant 0 : i32
    %c0_i32_0 = arith.constant 0 : i32
    return %arg0, %c0_i32 : i32, i32
  }
  func.func @transform_1(%arg0: i32) -> (i32, i32) {
    %c0_i32 = arith.constant 0 : i32
    %c0_i32_0 = arith.constant 0 : i32
    %c0_i32_1 = arith.constant 0 : i32
    return %c0_i32, %c0_i32_0 : i32, i32
  }
  func.func @transform_2(%arg0: i32) -> (i32, i32) {
    %c0_i32 = arith.constant 0 : i32
    %c0_i32_0 = arith.constant 0 : i32
    %c0_i32_1 = arith.constant 0 : i32
    return %c0_i32, %c0_i32_0 : i32, i32
  }
  func.func @transform_3(%arg0: i32) -> (i32, i32) {
    %c0_i32 = arith.constant 0 : i32
    %c0_i32_0 = arith.constant 0 : i32
    return %arg0, %c0_i32 : i32, i32
  }
}

</mosaic_0001>

<bundles_post_ra>
// kernel: tpu_custom_call.1
= control target key start
LH: loop header
LB: loop body
LE: loop exit
PB: predicated region body
PF: predicated region fallthrough
CT: control target
= control target key end

     0   :  { %s539_s12 = smov 0   ;;  %s584_s0 = inlined_call_operand.vmem [shape: f32[32,32], index: 0, kind: input, shape index: {}]   ;;  %s585_s1 = inlined_call_operand.vmem [shape: f32[32,16], index: 1, kind: input, shape index: {}]   ;;  %s586_s2 = inlined_call_operand.vmem [shape: f32[1,16], index: 2, kind: input, shape index: {}]   ;;  %s587_s3 = inlined_call_operand.vmem [shape: f32[32,16], index: 3, kind: output, shape index: {}]  }
   0x1 LB: > { %s435_s13 = sadd.s32 4294967295, %s515_s12   ;;  %p439_p0 = scmp.ge.s32.totalorder %s515_s12, 1  ;;  %s515_s12 = sphi %s539_s12, %s13_s12  }
   0x2   : > { %p138_p1 = scmp.lt.s32.totalorder %s515_s12, 3 }
   0x4   : > { %p139_p2 = pnand %p439_p0, %p138_p1 }
   0x5   : > { %v176_v0 = vld [vmem:[%s585_s1] sm:$0xff] (!%p139_p2)  ;;  %v177_v1 = vld [vmem:[%s585_s1 + $0x8] sm:$0xff] (!%p139_p2)  ;;  %v178_v2 = vld [vmem:[%s585_s1 + $0x10] sm:$0xff] (!%p139_p2)  ;;  %s440_s20 = sshll.u32 (!%p139_p2), %s435_s13, 1  ;;  %vm187_vm0 = vcmask (!%p139_p2), 261120   ;;  %vm269_vm1 = vcmask (!%p139_p2), 130048  }
   0x6   : > { %142 = sbr.rel (%p139_p2) target bundleno = 754 (0x2f2), region = 32  ;;  %v479_v3 = vpack.c.bf16 (!%p139_p2), %v177_v1, %v176_v0  ;;  %v179_v4 = vld [vmem:[%s585_s1 + $0x18] sm:$0xff] (!%p139_p2)  ;;  %p163_p3 = scmp.lt.s32.totalorder (!%p139_p2), %s440_s20, 3  ;;  %v444_v8 = vld [vmem:[%s586_s2] ss:$0 sm:$0xff] (!%p139_p2)  ;;  %v518_v24 = vmov (!%p139_p2), 0  }
   0x7   : > { %v483_v5 = vpack.c.bf16 (!%p139_p2), %v179_v4, %v178_v2  ;;  %v517_v15 = vmov (!%p139_p2), 1.0|1.0   ;;  %499 = vset.pattern.permute.xlu1 (!%p139_p2), %v518_v24  ;;  %500 = vset.pattern.permute.xlu0 (!%p139_p2), %v518_v24 }
   0x8   : > { %480 = vmatprep.subr.bf16.mxu0 (!%p139_p2), %v479_v3  ;;  %487 = vmatprep.subr.bf16.mxu1 (!%p139_p2), %v517_v15 }
   0x9   : > { %482 = vmatpush3.bf16.msra.mxu0 (!%p139_p2), %v479_v3  ;;  %488 = vmatpush3.bf16.msra.mxu1 (!%p139_p2), %v517_v15 }
   0xa   : > { %484 = vmatprep.subr.bf16.mxu0 (!%p139_p2), %v483_v5 }
   0xd   : > { %s589_s20 = smov (!%p163_p3, %s440_s20), 3  ;;  %486 = vmatpush3.bf16.msra.mxu0 %v483_v5 }
   0xe   : > { %s441_s23 = sshll.u32 %s589_s20, 3 }
   0xf   : > { %s166_s26 = scalar_lea.vmem %s584_s0, %s441_s23  ;;  %s172_s4 = scalar_lea.vmem %s587_s3, %s441_s23 }
  0x10   : > { %v174_v6 = vld [vmem:[%s166_s26] sm:$0xff]  ;;  %v175_v7 = vld [vmem:[%s166_s26 + $0x8] sm:$0xff] }
  0x11   : > { %469 = vmatprep.mubr.msk.f32.mxu0 %vm187_vm0, %v174_v6 }
  0x12   : > { %470 = vmatmul.mubr.msk.f32.vlgmr.msra.gmra.mrb[0].mxu0 %vm187_vm0, %v175_v7 }
  0xe5   : > { %v471_v9 = vpop.f32.mrb[0].mxu0 }
  0xe6   : > { %v260_v10 = vpop.f32.mrb[1].mxu0  ;;  %v266_v12 = vadd.f32 %v471_v9, %v444_v8 }
  0xe7   : > { %v261_v11 = vadd.f32 %v444_v8, %v260_v10 }
  0xe8   : > { %v273_v14 = vsel %vm269_vm1, %v266_v12, -inf }
  0xe9   : > { %v270_v13 = vsel %vm269_vm1, %v261_v11, -inf }
  0xea   : > { %271 = vmax.xlane.f32.xlu0 %v270_v13 }
  0xee   : > { %274 = vmax.xlane.f32.xlu0 %v273_v14 }
 0x177   : > { %v272_v16 = vpop.xlane.xlu0 %271 }
 0x178   : > { %v276_v17 = vsub.f32 %v261_v11, %v272_v16 }
 0x17a   : > { %v278_v18 = vmul.f32 1.442695, %v276_v17 }
 0x17b   : > { %v275_v19 = vpop.xlane.xlu0 %274 }
 0x17c   : > { %501 = vpow2.f32 %v278_v18  ;;  %v277_v20 = vsub.f32 %v266_v12, %v275_v19 }
 0x17e   : > { %v280_v21 = vmul.f32 1.442695, %v277_v20 }
 0x180   : > { %503 = vpow2.f32 %v280_v21 }
 0x186   : > { %v502_v22 = vpop.eup %501 }
 0x187   : > { %476 = vmatprep.mubr.msk.f32.mxu1 %vm269_vm1, %v502_v22 }
 0x18a   : > { %v504_v23 = vpop.eup %503 }
 0x18b   : > { %477 = vmatmul.mubr.msk.f32.vlgmr.msra.gmra.mrb[0].mxu1 %vm269_vm1, %v504_v23 }
 0x25e   : > { %v478_v25 = vpop.f32.mrb[0].mxu1 }
 0x25f   : > { %v354_v26 = vpop.f32.mrb[1].mxu1 }
 0x260   : > { %505 = vrcp.f32 %v354_v26 }
 0x261   : > { %507 = vrcp.f32 %v478_v25 }
 0x26a   : > { %v506_v27 = vpop.eup %505 }
 0x26b   : > { %367 = vperm.xlu1 %499, %v506_v27   ;;  %v508_v28 = vpop.eup %507 }
 0x26f   : > { %372 = vperm.xlu1 %499, %v508_v28  }
 0x2ea   : > { %v368_v29 = vpop.permute.xlu1 %367 }
 0x2eb   : > { %v375_v30 = vmul.f32 %v502_v22, %v368_v29 }
 0x2ed   : > { %377 = vst.msk [vmem:[%s172_s4] sm:$0xff] %vm269_vm1, %v375_v30 }
 0x2ee   : > { %v373_v31 = vpop.permute.xlu1 %372 }
 0x2ef   : > { %v376_v32 = vmul.f32 %v504_v23, %v373_v31 }
 0x2f1   : > { %378 = vst.msk [vmem:[%s172_s4 + $0x8] sm:$0xff] %vm269_vm1, %v376_v32 }
 0x2f2 PF: > { %s13_s12 = sadd.s32 1, %s515_s12  }
 0x2f3   : > { %p10_p4 = scmp.ge.s32.totalorder %s13_s12, 4  }
 0x2f5   :  { %12 = sbr.rel (!%p10_p4) target bundleno = 1 (0x1), region = 62 }

</bundles_post_ra>
